<compile_context>
chip_gen: v7x
topology: tpu7x:2x2x1
jax: 0.10.0
libtpu: 0.0.40
codegen_flags: <defaults>
</compile_context>

<pallas_src>
import functools

import jax
import jax.numpy as jnp
from jax.experimental import pallas as pl
from jax.experimental.pallas import tpu as pltpu


# --------------------------------------------------------------------------- #
# Kernel
# --------------------------------------------------------------------------- #
def _mlp_kernel(n_in, n_hidden, n_hidden_layers, n_out,
                x_ref, slab_ref, gd_ref, y_ref):
    """One batch tile of y = G + D * net(x) in (feature, batch) layout.

    x_ref:    (n_in, tile_n)            f32, batch on lanes
    slab_ref: (L+2, H, sec_w)           packed [W | b] sections (lane-aligned)
    gd_ref:   (2,) SMEM                 [G, D] runtime scalars
    y_ref:    (n_out, tile_n)           lane-dense output
    """
    H = n_hidden
    x = x_ref[...]                                     # (n_in, tile_n)
    tile_n = x.shape[1]

    # First layer: n_in is tiny (PINN time input) -> broadcasted VPU products
    # instead of a degenerate MXU matmul.
    w1 = slab_ref[0, :, 0:n_in]                        # (H, n_in)
    b1 = slab_ref[0, :, n_in:n_in + 1]                 # (H, 1)
    h = jnp.broadcast_to(b1, (H, tile_n))
    for k in range(n_in):
        h = h + w1[:, k:k + 1] * x[k:k + 1, :]
    h = jnp.tanh(h)

    # Hidden layers: (H, H) @ (H, tile_n) on the MXU; batch fills the N axis.
    for l in range(n_hidden_layers):
        w = slab_ref[1 + l, :, 0:H]                    # (H, H) torch (out,in)
        b = slab_ref[1 + l, :, H:H + 1]                # (H, 1)
        h = jnp.tanh(jnp.dot(w, h, preferred_element_type=jnp.float32) + b)

    # Output projection: (n_out, H) @ (H, tile_n).
    s_out = 1 + n_hidden_layers
    wo = slab_ref[s_out, 0:n_out, 0:H]                 # (n_out, H)
    bo = slab_ref[s_out, 0:n_out, H:H + 1]             # (n_out, 1)
    out = jnp.dot(wo, h, preferred_element_type=jnp.float32) + bo

    # Boundary-condition transform y = G + D * net(x); G, D from SMEM.
    y_ref[...] = gd_ref[0] + gd_ref[1] * out


# --------------------------------------------------------------------------- #
# Parameter packing (one contiguous, lane-aligned slab -> single DMA)
# --------------------------------------------------------------------------- #
def _section_width(n_in, n_hidden, n_out):
    need = max(n_hidden, n_in, n_out) + 1              # widest [W | b] section
    return 128 * ((need + 127) // 128)


def pack_params(w1, b1, wh, bh, wo, bo):
    """Pack torch-layout params into one (L+2, H, sec_w) f32 slab.

    w1 (H, n_in), b1 (H,), wh (L, H, H), bh (L, H), wo (n_out, H), bo (n_out,).
    Section s holds [W_s | b_s] starting at lane 0 (static, aligned offsets).
    """
    H, n_in = w1.shape
    L = wh.shape[0]
    n_out = wo.shape[0]
    sec_w = _section_width(n_in, H, n_out)
    slab = jnp.zeros((L + 2, H, sec_w), jnp.float32)
    slab = slab.at[0, :, 0:n_in].set(w1.astype(jnp.float32))
    slab = slab.at[0, :, n_in].set(jnp.reshape(b1, (H,)).astype(jnp.float32))
    for l in range(L):
        slab = slab.at[1 + l, :, 0:H].set(wh[l].astype(jnp.float32))
        slab = slab.at[1 + l, :, H].set(jnp.reshape(bh[l], (H,)).astype(jnp.float32))
    slab = slab.at[1 + L, 0:n_out, 0:H].set(wo.astype(jnp.float32))
    slab = slab.at[1 + L, 0:n_out, H].set(jnp.reshape(bo, (n_out,)).astype(jnp.float32))
    return slab


# --------------------------------------------------------------------------- #
# Wrapper
# --------------------------------------------------------------------------- #
def _choose_tile_n(N):
    """Single step for small N (overhead dominated); 512-2048-lane tiles for big N."""
    if N <= 2048 or N % 128 != 0:
        return N
    for cand in (1024, 2048, 1536, 512, 896, 768, 640, 384, 256, 128):
        if N % cand == 0:
            return cand
    return N


@functools.partial(jax.jit,
                   static_argnames=("n_out", "tile_n", "transposed_output"))
def mdof_pinn_forward(x, slab, G=0.0, D=1.0, *, n_out,
                      tile_n=None, transposed_output=False):
    """Pallas TPU implementation of mdof_pinn_stoch.forward: y = G + D * net(x).

    Args:
      x:    (N, n_in) f32 inputs (e.g. collocation times).
      slab: packed parameters from pack_params().
      G, D: runtime scalars (BC value / extension mask) -> SMEM, no recompile.
      n_out: static number of outputs (2 * n_dof).
      tile_n: optional batch tile override (must divide N; multiple of 128 if
              it tiles). Default: auto (single step for small N).
      transposed_output: if True, return the lane-dense (n_out, N) layout and
              skip the final transpose (preferred for fused consumers).
    """
    N, n_in = x.shape
    S, H, sec_w = slab.shape
    L = S - 2                                          # hidden (H->H) layers

    if tile_n is None:
        tile_n = _choose_tile_n(N)
    assert N % tile_n == 0, "tile_n must divide N"
    num_tiles = N // tile_n
    if num_tiles > 1:
        assert tile_n % 128 == 0, "tiled batch requires 128-lane multiples"

    # Batch onto the lane axis (for n_in == 1 this is a free reshape; the whole
    # wrapper is under one jit so layout ops fuse into this dispatch).
    x_t = x.T.astype(jnp.float32)                      # (n_in, N)
    gd = jnp.stack([jnp.asarray(G, jnp.float32).reshape(()),
                    jnp.asarray(D, jnp.float32).reshape(())])  # (2,)

    flops = 2 * N * (n_in * H + L * H * H + H * n_out)
    cost = pl.CostEstimate(
        flops=flops,
        transcendentals=N * H * (L + 1),
        bytes_accessed=4 * (x.size + slab.size + 2 + N * n_out))

    # Grid-invariant weight slab: single-buffer it when the batch is tiled
    # (halves its VMEM footprint, no per-step buffer-swap bookkeeping).
    slab_dims = (S, H, sec_w)
    if num_tiles > 1:
        slab_spec = pl.BlockSpec(slab_dims, lambda i: (0, 0, 0),
                                 pipeline_mode=pl.Buffered(1))
    else:
        slab_spec = pl.BlockSpec(slab_dims, lambda i: (0, 0, 0))

    kernel = functools.partial(_mlp_kernel, n_in, H, L, n_out)

    y_t = pl.pallas_call(
        kernel,
        out_shape=jax.ShapeDtypeStruct((n_out, N), jnp.float32),
        grid=(num_tiles,),
        in_specs=[
            pl.BlockSpec((n_in, tile_n), lambda i: (0, i)),      # x^T batch tile
            slab_spec,                                           # packed params
            pl.BlockSpec(memory_space=pltpu.MemorySpace.SMEM),   # [G, D] scalars
        ],
        out_specs=pl.BlockSpec((n_out, tile_n), lambda i: (0, i)),
        compiler_params=pltpu.CompilerParams(
            dimension_semantics=("parallel",)),
        cost_estimate=cost,
    )(x_t, slab, gd)

    if transposed_output:
        return y_t                                     # (n_out, N) lane-dense
    return y_t.T                                       # (N, n_out)


# --------------------------------------------------------------------------- #
# Init + pure-JAX reference
# --------------------------------------------------------------------------- #
def init_params(key, n_input, n_hidden, n_layers, n_output):
    """PyTorch nn.Linear default init U(-1/sqrt(fan_in), 1/sqrt(fan_in)), torch layout."""
    def linear(kw, kb, fan_in, fan_out):
        bound = 1.0 / float(fan_in) ** 0.5
        w = jax.random.uniform(kw, (fan_out, fan_in), jnp.float32, -bound, bound)
        b = jax.random.uniform(kb, (fan_out,), jnp.float32, -bound, bound)
        return w, b

    L = n_layers - 1
    keys = jax.random.split(key, 2 * (L + 2))
    w1, b1 = linear(keys[0], keys[1], n_input, n_hidden)
    wh_list, bh_list = [], []
    for l in range(L):
        w, b = linear(keys[2 + 2 * l], keys[3 + 2 * l], n_hidden, n_hidden)
        wh_list.append(w)
        bh_list.append(b)
    wo, bo = linear(keys[-2], keys[-1], n_hidden, n_output)
    wh = (jnp.stack(wh_list, 0) if L
          else jnp.zeros((0, n_hidden, n_hidden), jnp.float32))
    bh = jnp.stack(bh_list, 0) if L else jnp.zeros((0, n_hidden), jnp.float32)
    return w1, b1, wh, bh, wo, bo


def reference_forward(x, params, G, D):
    """Pure-JAX reference of the same forward pass (standard (N, feat) layout)."""
    w1, b1, wh, bh, wo, bo = params
    h = jnp.tanh(x @ w1.T + b1[None, :])
    for l in range(wh.shape[0]):
        h = jnp.tanh(h @ wh[l].T + bh[l][None, :])
    return G + D * (h @ wo.T + bo[None, :])


# --------------------------------------------------------------------------- #
# Self-test
# --------------------------------------------------------------------------- #
if __name__ == "__main__":
    # Config consistent with the PINN: input is time t (n_input=1),
    # state output z = [x; v] for n_dof=2 -> n_output=4.
    n_input, n_hidden, n_layers, n_dof = 1, 32, 3, 2
    n_output = 2 * n_dof

    key = jax.random.PRNGKey(0)
    kx, kp = jax.random.split(key)
    params = init_params(kp, n_input, n_hidden, n_layers, n_output)
    slab = pack_params(*params)

    # --- Small batch (N=256): single grid step, one parameter DMA, SMEM (G, D).
    x = jax.random.uniform(kx, (256, n_input), jnp.float32)
    y = mdof_pinn_forward(x, slab, 0.0, 1.0, n_out=n_output)
    y = jax.block_until_ready(y)
    y_ref = reference_forward(x, params, 0.0, 1.0)
    assert y.shape == (256, n_output)
    assert jnp.allclose(y, y_ref, rtol=1e-4, atol=1e-5), "mismatch (small batch)"

    # Different (G, D) on the SAME compiled kernel (runtime SMEM scalars).
    y2 = mdof_pinn_forward(x, slab, 0.25, 1.5, n_out=n_output)
    y2 = jax.block_until_ready(y2)
    y2_ref = reference_forward(x, params, 0.25, 1.5)
    assert jnp.allclose(y2, y2_ref, rtol=1e-4, atol=1e-5), "mismatch (G,D variant)"

    # --- Large collocation batch (N=4096): 1024-lane batch tiles, grid-invariant
    #     weights single-buffered, lane-dense (n_out, N) output consumed directly.
    xl = jax.random.uniform(jax.random.PRNGKey(1), (4096, n_input), jnp.float32)
    yl_t = mdof_pinn_forward(xl, slab, 0.0, 1.0, n_out=n_output,
                             transposed_output=True)
    yl_t = jax.block_until_ready(yl_t)
    assert yl_t.shape == (n_output, 4096)
    yl_ref = reference_forward(xl, params, 0.0, 1.0)
    assert jnp.allclose(yl_t.T, yl_ref, rtol=1e-4, atol=1e-5), "mismatch (tiled)"

    print("KERNEL_OK")
</pallas_src>

<mosaic_0001>
module attributes {stable_mosaic.version = 11 : i64} {
  func.func @_mlp_kernel(%arg0: i32, %arg1: memref<1x256xf32, #tpu.memory_space<vmem>>, %arg2: memref<4x32x128xf32, #tpu.memory_space<vmem>>, %arg3: memref<2xf32, #tpu.memory_space<smem>>, %arg4: memref<4x256xf32, #tpu.memory_space<vmem>>) attributes {dimension_semantics = [#tpu.dimension_semantics<parallel>], iteration_bounds = array<i64: 1>, scalar_prefetch = 0 : i64, scratch_operands = 0 : i64, tpu.core_type = #tpu.core_type<tc>, window_params = [{transform_indices = @transform_0, window_bounds = array<i64: 1, 256>}, {pipeline_mode = #tpu.pipeline_mode<synchronous>, transform_indices = @transform_1, window_bounds = array<i64: 4, 32, 128>}, {transform_indices = @transform_2, window_bounds = array<i64: 2>}, {transform_indices = @transform_3, window_bounds = array<i64: 4, 256>}]} {
    %c0 = arith.constant 0 : index
    %c0_0 = arith.constant 0 : index
    %0 = vector.load %arg1[%c0, %c0_0] : memref<1x256xf32, #tpu.memory_space<vmem>>, vector<1x256xf32>
    %c0_1 = arith.constant 0 : index
    %c0_2 = arith.constant 0 : index
    %c0_3 = arith.constant 0 : index
    %1 = vector.load %arg2[%c0_1, %c0_2, %c0_3] : memref<4x32x128xf32, #tpu.memory_space<vmem>>, vector<1x32x1xf32>
    %2 = vector.shape_cast %1 : vector<1x32x1xf32> to vector<32x1xf32>
    %c0_4 = arith.constant 0 : index
    %c0_5 = arith.constant 0 : index
    %c1 = arith.constant 1 : index
    %3 = vector.load %arg2[%c0_4, %c0_5, %c1] : memref<4x32x128xf32, #tpu.memory_space<vmem>>, vector<1x32x1xf32>
    %4 = vector.shape_cast %3 : vector<1x32x1xf32> to vector<32x1xf32>
    %5 = vector.shape_cast %4 : vector<32x1xf32> to vector<32x1xf32>
    %6 = vector.broadcast %5 : vector<32x1xf32> to vector<32x256xf32>
    %7 = vector.broadcast %2 : vector<32x1xf32> to vector<32x256xf32>
    %8 = vector.broadcast %0 : vector<1x256xf32> to vector<32x256xf32>
    %9 = arith.mulf %7, %8 : vector<32x256xf32>
    %10 = arith.addf %6, %9 : vector<32x256xf32>
    %11 = math.tanh %10 : vector<32x256xf32>
    %c1_6 = arith.constant 1 : index
    %c0_7 = arith.constant 0 : index
    %c0_8 = arith.constant 0 : index
    %12 = vector.load %arg2[%c1_6, %c0_7, %c0_8] : memref<4x32x128xf32, #tpu.memory_space<vmem>>, vector<1x32x32xf32>
    %13 = vector.shape_cast %12 : vector<1x32x32xf32> to vector<32x32xf32>
    %c1_9 = arith.constant 1 : index
    %c0_10 = arith.constant 0 : index
    %c32 = arith.constant 32 : index
    %14 = vector.load %arg2[%c1_9, %c0_10, %c32] : memref<4x32x128xf32, #tpu.memory_space<vmem>>, vector<1x32x1xf32>
    %15 = vector.shape_cast %14 : vector<1x32x1xf32> to vector<32x1xf32>
    %cst = arith.constant dense<0.000000e+00> : vector<32x256xf32>
    %16 = tpu.matmul %13, %11, %cst {dimension_numbers = #tpu.dot_dimension_numbers<[1], [0], [0], [1], [0, 0, 1, 1], [], []>} : vector<32x32xf32>, vector<32x256xf32>, vector<32x256xf32> -> vector<32x256xf32>
    %17 = vector.broadcast %15 : vector<32x1xf32> to vector<32x256xf32>
    %18 = arith.addf %16, %17 : vector<32x256xf32>
    %19 = math.tanh %18 : vector<32x256xf32>
    %c2 = arith.constant 2 : index
    %c0_11 = arith.constant 0 : index
    %c0_12 = arith.constant 0 : index
    %20 = vector.load %arg2[%c2, %c0_11, %c0_12] : memref<4x32x128xf32, #tpu.memory_space<vmem>>, vector<1x32x32xf32>
    %21 = vector.shape_cast %20 : vector<1x32x32xf32> to vector<32x32xf32>
    %c2_13 = arith.constant 2 : index
    %c0_14 = arith.constant 0 : index
    %c32_15 = arith.constant 32 : index
    %22 = vector.load %arg2[%c2_13, %c0_14, %c32_15] : memref<4x32x128xf32, #tpu.memory_space<vmem>>, vector<1x32x1xf32>
    %23 = vector.shape_cast %22 : vector<1x32x1xf32> to vector<32x1xf32>
    %cst_16 = arith.constant dense<0.000000e+00> : vector<32x256xf32>
    %24 = tpu.matmul %21, %19, %cst_16 {dimension_numbers = #tpu.dot_dimension_numbers<[1], [0], [0], [1], [0, 0, 1, 1], [], []>} : vector<32x32xf32>, vector<32x256xf32>, vector<32x256xf32> -> vector<32x256xf32>
    %25 = vector.broadcast %23 : vector<32x1xf32> to vector<32x256xf32>
    %26 = arith.addf %24, %25 : vector<32x256xf32>
    %27 = math.tanh %26 : vector<32x256xf32>
    %c3 = arith.constant 3 : index
    %c0_17 = arith.constant 0 : index
    %c0_18 = arith.constant 0 : index
    %28 = vector.load %arg2[%c3, %c0_17, %c0_18] : memref<4x32x128xf32, #tpu.memory_space<vmem>>, vector<1x4x32xf32>
    %29 = vector.shape_cast %28 : vector<1x4x32xf32> to vector<4x32xf32>
    %c3_19 = arith.constant 3 : index
    %c0_20 = arith.constant 0 : index
    %c32_21 = arith.constant 32 : index
    %30 = vector.load %arg2[%c3_19, %c0_20, %c32_21] : memref<4x32x128xf32, #tpu.memory_space<vmem>>, vector<1x4x1xf32>
    %31 = vector.shape_cast %30 : vector<1x4x1xf32> to vector<4x1xf32>
    %cst_22 = arith.constant dense<0.000000e+00> : vector<4x256xf32>
    %32 = tpu.matmul %29, %27, %cst_22 {dimension_numbers = #tpu.dot_dimension_numbers<[1], [0], [0], [1], [0, 0, 1, 1], [], []>} : vector<4x32xf32>, vector<32x256xf32>, vector<4x256xf32> -> vector<4x256xf32>
    %33 = vector.broadcast %31 : vector<4x1xf32> to vector<4x256xf32>
    %34 = arith.addf %32, %33 : vector<4x256xf32>
    %c0_23 = arith.constant 0 : index
    %35 = memref.load %arg3[%c0_23] : memref<2xf32, #tpu.memory_space<smem>>
    %c1_24 = arith.constant 1 : index
    %36 = memref.load %arg3[%c1_24] : memref<2xf32, #tpu.memory_space<smem>>
    %37 = vector.broadcast %36 : f32 to vector<4x256xf32>
    %38 = arith.mulf %37, %34 : vector<4x256xf32>
    %39 = vector.broadcast %35 : f32 to vector<4x256xf32>
    %40 = arith.addf %39, %38 : vector<4x256xf32>
    %c0_25 = arith.constant 0 : index
    %c0_26 = arith.constant 0 : index
    %41 = vector.load %arg4[%c0_25, %c0_26] : memref<4x256xf32, #tpu.memory_space<vmem>>, vector<4x256xf32>
    tpu.vector_store %arg4[%c0_25, %c0_26], %40 {strides = array<i32>} : memref<4x256xf32, #tpu.memory_space<vmem>>, vector<4x256xf32>,
    return
  }
  func.func @transform_0(%arg0: i32) -> (i32, i32) {
    %c0_i32 = arith.constant 0 : i32
    %c0_i32_0 = arith.constant 0 : i32
    return %c0_i32, %arg0 : i32, i32
  }
  func.func @transform_1(%arg0: i32) -> (i32, i32, i32) {
    %c0_i32 = arith.constant 0 : i32
    %c0_i32_0 = arith.constant 0 : i32
    %c0_i32_1 = arith.constant 0 : i32
    %c0_i32_2 = arith.constant 0 : i32
    return %c0_i32, %c0_i32_0, %c0_i32_1 : i32, i32, i32
  }
  func.func @transform_2(%arg0: i32) -> i32 {
    %c0_i32 = arith.constant 0 : i32
    %c0_i32_0 = arith.constant 0 : i32
    return %c0_i32 : i32
  }
  func.func @transform_3(%arg0: i32) -> (i32, i32) {
    %c0_i32 = arith.constant 0 : i32
    %c0_i32_0 = arith.constant 0 : i32
    return %c0_i32, %arg0 : i32, i32
  }
}

</mosaic_0001>

<bundles_post_ra>
// kernel: mdof_pinn_forward.1
= control target key start
LH: loop header
LB: loop body
LE: loop exit
PB: predicated region body
PF: predicated region fallthrough
CT: control target
= control target key end

     0   :  { %8 = vsyncpa [#allocation3], 0  ;;  %s761_s0 = inlined_call_operand.vmem [shape: f32[1,256], index: 0, kind: input, shape index: {}]   ;;  %s762_s1 = inlined_call_operand.hbm [shape: f32[4,32,128], index: 1, kind: input, shape index: {}]   ;;  %s763_s2 = inlined_call_operand.vmem [shape: f32[2], index: 2, kind: input, shape index: {}]   ;;  %s764_s3 = inlined_call_operand.hbm [shape: f32[4,256], index: 3, kind: output, shape index: {}]  }
   0x1   :  { %9 = vsyncpa [#allocation5], 0 }
   0x2   :  { %10 = vsyncpa [#allocation4], 0  ;;  %s648_s12 = smov [#allocation2]   ;;  %s31_s16 = sshll.u32 %s763_s2, 4  ;;  %s32_s16 = int_to_ptr.vmem [resolvable:$true] %s31_s16 }
   0x3   :  { %s18_s13 = sshll.u32 %s648_s12, 4  ;;  %s586_s19 = scalar_lea.hbm %s762_s1, 2048  ;;  %s19_s13 = int_to_ptr.vmem [resolvable:$true] %s18_s13 }
   0x4   :  { %p587_p0 = scmp.ne.s32.totalorder %s762_s1, %s586_s19  ;;  %p590_p1 = scmp.lt.u32.totalorder %s586_s19, %s762_s1 }
   0x6   :  { %p592_p2 = pnand %p590_p1, %p587_p0 }
   0x8   :  { %595 = shalt.err (!%p592_p2)
}
   0x9   :  { %s596_s24 = scalar_lea.vmem %s19_s13, 2048  ;;  %p601_p4 = scmp.lt.s32.totalorder %s19_s13, %s19_s13 }
   0xa   :  { %p597_p3 = scmp.ne.s32.totalorder %s19_s13, %s596_s24  ;;  %p602_p5 = scmp.lt.s32.totalorder %s596_s24, %s596_s24 }
   0xc   :  { %p603_p6 = por %p602_p5, %p601_p4 }
   0xe   :  { %p604_p7 = pnand %p603_p6, %p597_p3 }
  0x10   :  { %607 = shalt.err (!%p604_p7)
}
  0x11   :  { %s649_s2 = smov 128   ;;  %s650_s25 = smov 8  }
  0x12   :  { %24 = dma.hbm_to_vmem [thread:$0]  %s762_s1, 2048, %s19_s13, [#allocation3], %s649_s2, %s649_s2, %s650_s25  }
  0x13   :  { %s608_s28 = scalar_lea.vmem %s32_s16, 16  ;;  %p613_p9 = scmp.lt.s32.totalorder %s32_s16, %s32_s16 }
  0x14   :  { %p609_p8 = scmp.ne.s32.totalorder %s32_s16, %s608_s28  ;;  %p614_p10 = scmp.lt.s32.totalorder %s608_s28, %s608_s28 }
  0x16   :  { %p615_p11 = por %p614_p10, %p613_p9 }
  0x18   :  { %p616_p12 = pnand %p615_p11, %p609_p8 }
  0x1a   :  { %619 = shalt.err (!%p616_p12)
}
  0x1b   :  { %s651_s29 = smov [#allocation6]  }
  0x1c   :  { %34 = dma.vmem_to_smem %s32_s16, 16, %s651_s29, [#allocation5]  }
  0x1d   :  { %642 = dma.done.wait [#allocation3], 2048  }
  0x1e   :  { %643 = vsyncadd [#allocation3], 4294965248 }
  0x1f   :  { %644 = dma.done.wait [#allocation5], 16  }
  0x20   :  { %645 = vsyncadd [#allocation5], 4294967280 }
  0x21   :  { %41 = sfence }
  0x22   :  { %v43_v0 = vld [vmem:[#allocation2] sm:$0xff]  ;;  %v652_v1 = vmov 0   ;;  %v653_v2 = vmov 1   ;;  %v44_v3 = vld [vmem:[#allocation2 + $0x8] sm:$0xff]  ;;  %v45_v4 = vld [vmem:[#allocation2 + $0x10] sm:$0xff]  ;;  %v654_v6 = vmov 0.0   ;;  %v84_v17 = vlaneseq }
  0x23   :  { %531 = vset.pattern.permute.xlu0 %v652_v1  ;;  %532 = vset.pattern.permute.xlu1 %v653_v2  ;;  %v46_v5 = vld [vmem:[#allocation2 + $0x18] sm:$0xff]  ;;  %v694_v7 = vld [vmem:[#allocation2 + $0x20] sm:$0xff]  ;;  %v696_v8 = vld [vmem:[#allocation2 + $0x28] sm:$0xff]  ;;  %v655_v9 = vmov 32   ;;  %vm143_vm0 = vcmask 261120   ;;  %s459_s4 = sld [smem:[#allocation6]] }
  0x24   :  { %49 = vperm.xlu1 %532, %v43_v0   ;;  %68 = vperm.xlu0 %531, %v43_v0   ;;  %v700_v10 = vld [vmem:[#allocation2 + $0x40] sm:$0xff]  ;;  %v702_v11 = vld [vmem:[#allocation2 + $0x30] sm:$0xff]  ;;  %v708_v13 = vld [vmem:[#allocation2 + $0x38] sm:$0xff]  ;;  %v85_v18 = vshrl.u32 %v84_v17, 7  ;;  %s656_s5 = smov [#allocation7]  }
  0x25   :  { %216 = vmatprep.mubr.f32.mxu0 %v654_v6  ;;  %346 = vmatprep.mubr.f32.mxu1 %v654_v6  ;;  %v706_v12 = vld [vmem:[#allocation2 + $0x50] sm:$0xff]  ;;  %v712_v14 = vld [vmem:[#allocation2 + $0x48] sm:$0xff]  ;;  %v714_v15 = vld [vmem:[#allocation2 + $0x60] sm:$0xf]  ;;  %s478_s6 = sshll.u32 %s656_s5, 4  ;;  %s479_s6 = int_to_ptr.vmem [resolvable:$true] %s478_s6 }
  0x26   :  { %v718_v16 = vld [vmem:[#allocation2 + $0x58] sm:$0xff]  ;;  %v86_v19 = vsub.s32 0, %v85_v18  ;;  %v90_v20 = vsub.s32 1, %v85_v18  ;;  %v42_v21 = vld [vmem:[%s761_s0] sm:$0x3]  ;;  %s497_s0 = sld [smem:[#allocation6 + $0x1]]  ;;  %p625_p0 = scmp.lt.s32.totalorder %s479_s6, %s479_s6 }
  0x27   :  { %s620_s7 = scalar_lea.vmem %s479_s6, 128 }
  0x28   :  { %54 = vperm.xlu1 %532, %v44_v3   ;;  %72 = vperm.xlu0 %531, %v44_v3   ;;  %v87_v22 = vrot.slane %v42_v21, %v86_v19  ;;  %v91_v23 = vrot.slane %v42_v21, %v90_v20  ;;  %p621_p13 = scmp.ne.s32.totalorder %s479_s6, %s620_s7  ;;  %p626_p1 = scmp.lt.s32.totalorder %s620_s7, %s620_s7 }
  0x2a   :  { %p627_p2 = por %p626_p1, %p625_p0 }
  0x2c   :  { %533 = vset.pattern.permute.xlu1 %v652_v1  ;;  %76 = vperm.xlu0 %531, %v45_v4   ;;  %p628_p3 = pnand %p627_p2, %p621_p13 }
  0x2d   :  { %80 = vperm.xlu1 %533, %v46_v5  }
  0x30   :  { %534 = vset.pattern.permute.xlu0 %v653_v2 }
  0x31   :  { %535 = vset.pattern.permute.xlu1 %v653_v2  ;;  %59 = vperm.xlu0 %534, %v45_v4  }
  0x32   :  { %64 = vperm.xlu1 %535, %v46_v5  }
  0x35   :  { %537 = vset.pattern.permute.xlu0 %v655_v9 }
  0x36   :  { %536 = vset.pattern.permute.xlu1 %v655_v9  ;;  %130 = vperm.xlu0 %537, %v696_v8  }
  0x37   :  { %125 = vperm.xlu1 %536, %v694_v7  }
  0x3a   :  { %256 = vperm.xlu0 %537, %v700_v10  }
  0x3b   :  { %135 = vperm.xlu1 %536, %v702_v11  }
  0x3e   :  { %266 = vperm.xlu0 %537, %v706_v12  }
  0x3f   :  { %140 = vperm.xlu1 %536, %v708_v13  }
  0x42   :  { %383 = vperm.xlu0 %537, %v714_v15  }
  0x43   :  { %261 = vperm.xlu1 %536, %v712_v14  }
  0x47   :  { %271 = vperm.xlu1 %536, %v718_v16  }
  0xa3   :  { %v50_v24 = vpop.permute.xlu1 %49  ;;  %v69_v25 = vpop.permute.xlu0 %68 }
  0xa4   :  { %v94_v26 = vmul.f32 %v87_v22, %v69_v25  ;;  %v95_v27 = vmul.f32 %v91_v23, %v69_v25 }
  0xa6   :  { %v102_v28 = vadd.f32 %v94_v26, %v50_v24  ;;  %v103_v29 = vadd.f32 %v95_v27, %v50_v24 }
  0xa7   :  { %v55_v30 = vpop.permute.xlu1 %54  ;;  %v73_v31 = vpop.permute.xlu0 %72 }
  0xa8   :  { %v96_v32 = vmul.f32 %v87_v22, %v73_v31  ;;  %v97_v33 = vmul.f32 %v91_v23, %v73_v31  ;;  %538 = vtanh.f32 %v102_v28 }
  0xa9   :  { %540 = vtanh.f32 %v103_v29 }
  0xaa   :  { %v104_v34 = vadd.f32 %v96_v32, %v55_v30  ;;  %v105_v35 = vadd.f32 %v97_v33, %v55_v30 }
  0xab   :  { %v77_v36 = vpop.permute.xlu0 %76 }
  0xac   :  { %542 = vtanh.f32 %v104_v34  ;;  %v81_v37 = vpop.permute.xlu1 %80  ;;  %v98_v38 = vmul.f32 %v87_v22, %v77_v36  ;;  %v99_v39 = vmul.f32 %v91_v23, %v77_v36 }
  0xad   :  { %544 = vtanh.f32 %v105_v35  ;;  %v100_v40 = vmul.f32 %v87_v22, %v81_v37  ;;  %v101_v41 = vmul.f32 %v91_v23, %v81_v37 }
  0xb0   :  { %v60_v42 = vpop.permute.xlu0 %59 }
  0xb1   :  { %v106_v43 = vadd.f32 %v98_v38, %v60_v42  ;;  %v107_v44 = vadd.f32 %v99_v39, %v60_v42  ;;  %v65_v45 = vpop.permute.xlu1 %64 }
  0xb2   :  { %v108_v46 = vadd.f32 %v100_v40, %v65_v45  ;;  %v109_v47 = vadd.f32 %v101_v41, %v65_v45  ;;  %v539_v48 = vpop.eup %538 }
  0xb3   :  { %546 = vtanh.f32 %v106_v43  ;;  %v541_v49 = vpop.eup %540 }
  0xb4   :  { %548 = vtanh.f32 %v107_v44 }
  0xb5   :  { %550 = vtanh.f32 %v108_v46  ;;  %v131_v1 = vpop.permute.xlu0 %130 }
  0xb6   :  { %v543_v50 = vpop.eup %542  ;;  %552 = vtanh.f32 %v109_v47  ;;  %v126_v60 = vpop.permute.xlu1 %125 }
  0xb7   :  { %v545_v51 = vpop.eup %544  ;;  %v500_v52 = vpack.c.bf16 %v543_v50, %v539_v48 }
  0xb8   :  { %v498_v53 = vpack.c.bf16 %v545_v51, %v541_v49 }
  0xb9   :  { %v257_v34 = vpop.permute.xlu0 %256 }
  0xba   :  { %499 = vmatprep.subr.bf16.mxu0 %v498_v53  ;;  %v136_v5 = vpop.permute.xlu1 %135 }
  0xbb   :  { %501 = vmatpush1.bf16.msra.mxu0 %v500_v52 }
  0xbd   :  { %v547_v54 = vpop.eup %546  ;;  %v267_v42 = vpop.permute.xlu0 %266 }
  0xbe   :  { %v549_v55 = vpop.eup %548  ;;  %v141_v17 = vpop.permute.xlu1 %140 }
  0xbf   :  { %v551_v56 = vpop.eup %550 }
  0xc0   :  { %v553_v57 = vpop.eup %552  ;;  %v504_v58 = vpack.c.bf16 %v551_v56, %v547_v54 }
  0xc1   :  { %v502_v59 = vpack.c.bf16 %v553_v57, %v549_v55 }
  0xc2   :  { %v262_v38 = vpop.permute.xlu1 %261 }
  0xc3   :  { %503 = vmatprep.subr.bf16.mxu0 %v502_v59 }
  0xc4   :  { %505 = vmatpush1.bf16.msra.mxu0 %v504_v58 }
  0xc7   :  { %488 = vmatmul.mubr.msk.f32.vlgmr.msra.gmra.mrb[0].mxu0 %vm143_vm0, %v694_v7 }
  0xc8   :  { %222 = vmatprep.mubr.f32.mxu0 %v654_v6 }
  0xcb   :  { %489 = vmatmul.mubr.msk.f32.gmra.mrb[2].mxu0 %vm143_vm0, %v696_v8 }
  0xcc   :  { %228 = vmatprep.mubr.f32.mxu0 %v654_v6 }
  0xcf   :  { %490 = vmatmul.mubr.msk.f32.gmra.mrb[4].mxu0 %vm143_vm0, %v702_v11 }
  0xd0   :  { %234 = vmatprep.mubr.f32.mxu0 %v654_v6 }
  0xd3   :  { %491 = vmatmul.mubr.msk.f32.gmra.mrb[6].mxu0 %vm143_vm0, %v708_v13 }
  0xd4   :  { %452 = vmatprep.mubr.f32.mxu0 %v654_v6 }
 0x19a   :  { %v218_v61 = vpop.f32.mrb[0].mxu0 }
 0x19b   :  { %v219_v62 = vadd.f32 %v218_v61, %v126_v60  ;;  %v220_v63 = vpop.f32.mrb[1].mxu0  ;;  %v384_v61 = vpop.permute.xlu0 %383 }
 0x19c   :  { %v221_v0 = vadd.f32 %v220_v63, %v126_v60  ;;  %v461_v63 = vstv %s497_s0 }
 0x19d   :  { %554 = vtanh.f32 %v219_v62 }
 0x19e   :  { %v224_v2 = vpop.f32.mrb[2].mxu0  ;;  %556 = vtanh.f32 %v221_v0 }
 0x19f   :  { %v225_v3 = vadd.f32 %v224_v2, %v131_v1  ;;  %v226_v4 = vpop.f32.mrb[3].mxu0 }
 0x1a0   :  { %v227_v7 = vadd.f32 %v226_v4, %v131_v1 }
 0x1a1   :  { %558 = vtanh.f32 %v225_v3  ;;  %v464_v3 = vstv %s459_s4 }
 0x1a2   :  { %560 = vtanh.f32 %v227_v7  ;;  %v230_v8 = vpop.f32.mrb[4].mxu0 }
 0x1a3   :  { %v231_v9 = vadd.f32 %v230_v8, %v136_v5  ;;  %v232_v11 = vpop.f32.mrb[5].mxu0 }
 0x1a4   :  { %v233_v13 = vadd.f32 %v232_v11, %v136_v5 }
 0x1a5   :  { %562 = vtanh.f32 %v231_v9 }
 0x1a6   :  { %v236_v18 = vpop.f32.mrb[6].mxu0  ;;  %564 = vtanh.f32 %v233_v13 }
 0x1a7   :  { %v237_v19 = vadd.f32 %v236_v18, %v141_v17  ;;  %v238_v20 = vpop.f32.mrb[7].mxu0  ;;  %v555_v22 = vpop.eup %554 }
 0x1a8   :  { %v239_v21 = vadd.f32 %v238_v20, %v141_v17  ;;  %v557_v23 = vpop.eup %556 }
 0x1a9   :  { %566 = vtanh.f32 %v237_v19 }
 0x1aa   :  { %568 = vtanh.f32 %v239_v21 }
 0x1ab   :  { %v559_v24 = vpop.eup %558 }
 0x1ac   :  { %v561_v25 = vpop.eup %560  ;;  %v508_v26 = vpack.c.bf16 %v559_v24, %v555_v22 }
 0x1ad   :  { %v506_v27 = vpack.c.bf16 %v561_v25, %v557_v23 }
 0x1af   :  { %507 = vmatprep.subr.bf16.mxu1 %v506_v27  ;;  %v563_v28 = vpop.eup %562 }
 0x1b0   :  { %509 = vmatpush1.bf16.msra.mxu1 %v508_v26  ;;  %v565_v29 = vpop.eup %564 }
 0x1b3   :  { %v567_v30 = vpop.eup %566 }
 0x1b4   :  { %v569_v31 = vpop.eup %568  ;;  %v512_v32 = vpack.c.bf16 %v567_v30, %v563_v28 }
 0x1b5   :  { %v510_v33 = vpack.c.bf16 %v569_v31, %v565_v29 }
 0x1b7   :  { %511 = vmatprep.subr.bf16.mxu1 %v510_v33 }
 0x1b8   :  { %513 = vmatpush1.bf16.msra.mxu1 %v512_v32 }
 0x1bb   :  { %492 = vmatmul.mubr.msk.f32.vlgmr.msra.gmra.mrb[0].mxu1 %vm143_vm0, %v700_v10 }
 0x1bc   :  { %352 = vmatprep.mubr.f32.mxu1 %v654_v6 }
 0x1bf   :  { %493 = vmatmul.mubr.msk.f32.gmra.mrb[2].mxu1 %vm143_vm0, %v712_v14 }
 0x1c0   :  { %358 = vmatprep.mubr.f32.mxu1 %v654_v6 }
 0x1c3   :  { %494 = vmatmul.mubr.msk.f32.gmra.mrb[4].mxu1 %vm143_vm0, %v706_v12 }
 0x1c4   :  { %364 = vmatprep.mubr.f32.mxu1 %v654_v6 }
 0x1c7   :  { %495 = vmatmul.mubr.msk.f32.gmra.mrb[6].mxu1 %vm143_vm0, %v718_v16  ;;  %v272_v16 = vpop.permute.xlu1 %271 }
 0x28e   :  { %v348_v35 = vpop.f32.mrb[0].mxu1 }
 0x28f   :  { %v349_v36 = vadd.f32 %v348_v35, %v257_v34  ;;  %v350_v37 = vpop.f32.mrb[1].mxu1 }
 0x290   :  { %v351_v10 = vadd.f32 %v350_v37, %v257_v34 }
 0x291   :  { %570 = vtanh.f32 %v349_v36 }
 0x292   :  { %v354_v39 = vpop.f32.mrb[2].mxu1  ;;  %572 = vtanh.f32 %v351_v10 }
 0x293   :  { %v355_v40 = vadd.f32 %v354_v39, %v262_v38  ;;  %v356_v14 = vpop.f32.mrb[3].mxu1 }
 0x294   :  { %v357_v41 = vadd.f32 %v356_v14, %v262_v38 }
 0x295   :  { %574 = vtanh.f32 %v355_v40 }
 0x296   :  { %576 = vtanh.f32 %v357_v41  ;;  %v360_v12 = vpop.f32.mrb[4].mxu1 }
 0x297   :  { %v361_v6 = vadd.f32 %v360_v12, %v267_v42  ;;  %v362_v43 = vpop.f32.mrb[5].mxu1 }
 0x298   :  { %v363_v44 = vadd.f32 %v362_v43, %v267_v42 }
 0x299   :  { %578 = vtanh.f32 %v361_v6 }
 0x29a   :  { %v366_v45 = vpop.f32.mrb[6].mxu1  ;;  %580 = vtanh.f32 %v363_v44 }
 0x29b   :  { %v367_v46 = vadd.f32 %v366_v45, %v272_v16  ;;  %v368_v47 = vpop.f32.mrb[7].mxu1  ;;  %v571_v49 = vpop.eup %570 }
 0x29c   :  { %v369_v48 = vadd.f32 %v368_v47, %v272_v16  ;;  %v573_v50 = vpop.eup %572 }
 0x29d   :  { %582 = vtanh.f32 %v367_v46 }
 0x29e   :  { %584 = vtanh.f32 %v369_v48 }
 0x29f   :  { %v575_v51 = vpop.eup %574 }
 0x2a0   :  { %v577_v52 = vpop.eup %576  ;;  %v516_v53 = vpack.c.bf16 %v575_v51, %v571_v49 }
 0x2a1   :  { %v514_v54 = vpack.c.bf16 %v577_v52, %v573_v50 }
 0x2a3   :  { %515 = vmatprep.subr.bf16.mxu0 %v514_v54  ;;  %v579_v55 = vpop.eup %578 }
 0x2a4   :  { %517 = vmatpush1.bf16.msra.mxu0 %v516_v53  ;;  %v581_v56 = vpop.eup %580 }
 0x2a7   :  { %v583_v57 = vpop.eup %582 }
 0x2a8   :  { %v585_v58 = vpop.eup %584  ;;  %v520_v59 = vpack.c.bf16 %v583_v57, %v579_v55 }
 0x2a9   :  { %v518_v60 = vpack.c.bf16 %v585_v58, %v581_v56 }
 0x2ab   :  { %519 = vmatprep.subr.bf16.mxu0 %v518_v60 }
 0x2ac   :  { %521 = vmatpush1.bf16.msra.mxu0 %v520_v59 }
 0x2af   :  { %496 = vmatmul.mubr.msk.f32.vlgmr.msra.gmra.mrb[8].mxu0 %vm143_vm0, %v714_v15 }
 0x382   :  { %v454_v62 = vpop.f32.mrb[8].mxu0 }
 0x383   :  { %v455_v0 = vadd.f32 %v454_v62, %v384_v61  ;;  %v456_v1 = vpop.f32.mrb[9].mxu0 }
 0x384   :  { %v457_v2 = vadd.f32 %v456_v1, %v384_v61 }
 0x385   :  { %v462_v4 = vmul.f32 %v461_v63, %v455_v0 }
 0x386   :  { %v463_v5 = vmul.f32 %v461_v63, %v457_v2 }
 0x387   :  { %v465_v7 = vadd.f32 %v464_v3, %v462_v4 }
 0x388   :  { %v466_v8 = vadd.f32 %v464_v3, %v463_v5 }
 0x38a   :  { %v469_v9 = vcombine.low %v465_v7, %v466_v8 }
 0x38c   :  { %471 = vst [vmem:[#allocation7] sm:$0xff] %v469_v9 }
 0x38d   :  { %631 = shalt.err (!%p628_p3)
}
 0x38e   :  { %s632_s10 = scalar_lea.hbm %s764_s3, 128 }
 0x38f   :  { %p633_p4 = scmp.ne.s32.totalorder %s764_s3, %s632_s10  ;;  %p636_p5 = scmp.lt.u32.totalorder %s632_s10, %s764_s3 }
 0x391   :  { %p638_p6 = pnand %p636_p5, %p633_p4 }
 0x393   :  { %641 = shalt.err (!%p638_p6)
}
 0x394   :  { %481 = dma.vmem_to_hbm [thread:$0]  %s479_s6, 128, %s764_s3, [#allocation4]  }
 0x395   :  { %646 = dma.done.wait [#allocation4], 128  }
 0x396   :  { %647 = vsyncadd [#allocation4], 4294967168 }
 0x397   :  { %485 = vsyncpa [#allocation3], 1 }
 0x398   :  { %486 = vsyncpa [#allocation4], 1 }
 0x399   :  { %487 = vsyncpa [#allocation5], 1 }

</bundles_post_ra>
